<compile_context>
chip_gen: v6e
topology: v6e:2x2x1
jax: 0.10.0
libtpu: 0.0.40
codegen_flags: <defaults>
</compile_context>

<pallas_src>
import functools

import jax
import jax.numpy as jnp
from jax import lax
from jax.experimental import pallas as pl
from jax.experimental.pallas import tpu as pltpu


def _round_up(x, m):
    return ((x + m - 1) // m) * m


def _conv1d_kernel(x_ref, xh_ref, w_ref, b_ref, o_ref, *, dilation, kernel_size):
    """One (batch, time-tile) grid step, K > 1 path.

    x_ref : (1, C_in, T_TILE)    main input tile (zero-padded input, compute dtype)
    xh_ref: (1, C_in, HALO_BLK)  right-halo tile of the same input (covers all taps)
    w_ref : (C_out, K*C_in)      lane-dense weight, k-major along the lane axis
    b_ref : (C_out, 1)           f32 bias
    o_ref : (1, C_out, T_TILE)   output tile
    """
    t_tile = o_ref.shape[-1]
    # (C_in, T_TILE + HALO_BLK): main tile plus right halo.
    x = jnp.concatenate([x_ref[0], xh_ref[0]], axis=-1)
    # im2col: stack the K shifted views along the sublane axis -> (K*C_in, T_TILE).
    xcol = jnp.concatenate(
        [x[:, k * dilation:k * dilation + t_tile] for k in range(kernel_size)],
        axis=0)
    # Single fused MXU matmul, f32 accumulation, then bias epilogue.
    acc = jnp.dot(w_ref[...], xcol, preferred_element_type=jnp.float32)
    o_ref[0] = (acc + b_ref[...]).astype(o_ref.dtype)


def _conv1d_k1_kernel(x_ref, w_ref, b_ref, o_ref):
    """K == 1 (pointwise) path: plain matmul + bias, no halo / no im2col.

    x_ref : (1, C_in, T_TILE)
    w_ref : (C_out, C_in)
    b_ref : (C_out, 1)
    o_ref : (1, C_out, T_TILE)
    """
    acc = jnp.dot(w_ref[...], x_ref[0], preferred_element_type=jnp.float32)
    o_ref[0] = (acc + b_ref[...]).astype(o_ref.dtype)


def conv_norm_forward(x, weight, bias=None, *, stride=1, padding=None, dilation=1,
                      compute_dtype=jnp.bfloat16, t_tile=512):
    """Pallas equivalent of ConvNorm.forward (PyTorch Conv1d, NCW layout).

    NOTE: for toy shapes (C_in < ~32, T < ~256) lax.conv_general_dilated is just
    as fast; this kernel targets production-sized ConvNorm (C ~ 512, T ~ 2-8k).
    """
    B, C_in, T = x.shape
    C_out, C_in_w, K = weight.shape
    assert C_in == C_in_w
    if padding is None:
        assert K % 2 == 1
        padding = int(dilation * (K - 1) / 2)

    halo = dilation * (K - 1)
    t_out = T + 2 * padding - halo                 # stride-1 output length

    # Lane-dense weight: (C_out, C_in, K) -> (C_out, K*C_in), k-major, matching the
    # im2col row order used inside the kernel (for K == 1 this is just a squeeze).
    w2 = jnp.transpose(weight, (0, 2, 1)).reshape(C_out, K * C_in).astype(compute_dtype)
    if bias is None:
        bias = jnp.zeros((C_out,), jnp.float32)
    b2 = bias.astype(jnp.float32).reshape(C_out, 1)

    if K == 1:
        # Pointwise path: no halo, tile only needs to be 128-lane aligned.
        t_tile_ = min(_round_up(t_tile, 128), _round_up(t_out, 128))
        n_t = pl.cdiv(t_out, t_tile_)
        t_out_pad = n_t * t_tile_
        x_pad = jnp.pad(x.astype(compute_dtype),
                        ((0, 0), (0, 0), (padding, t_out_pad - padding - T)))

        out = pl.pallas_call(
            _conv1d_k1_kernel,
            out_shape=jax.ShapeDtypeStruct((B, C_out, t_out_pad), x.dtype),
            grid=(B, n_t),
            in_specs=[
                pl.BlockSpec((1, C_in, t_tile_), lambda b, t: (b, 0, t)),
                # weight / bias: constant block index -> fetched once, VMEM-resident
                pl.BlockSpec((C_out, C_in), lambda b, t: (0, 0)),
                pl.BlockSpec((C_out, 1), lambda b, t: (0, 0)),
            ],
            out_specs=pl.BlockSpec((1, C_out, t_tile_), lambda b, t: (b, 0, t)),
            compiler_params=pltpu.CompilerParams(
                dimension_semantics=("parallel", "parallel")),
            cost_estimate=pl.CostEstimate(
                flops=2 * B * C_out * C_in * t_out_pad,
                transcendentals=0,
                bytes_accessed=(x_pad.size * x_pad.dtype.itemsize
                                + w2.size * w2.dtype.itemsize
                                + B * C_out * t_out_pad
                                * jnp.dtype(x.dtype).itemsize)),
        )(x_pad, w2, b2)
    else:
        # General (K > 1, possibly dilated) path with a right-halo block.
        # Tile sizes: T_TILE is a multiple of HALO_BLK (itself a multiple of 128)
        # -> lane-dense (unmasked) output stores and integer halo block indices.
        halo_blk = max(128, _round_up(halo, 128))
        t_tile_ = min(_round_up(t_tile, halo_blk), _round_up(t_out, halo_blk))
        n_t = pl.cdiv(t_out, t_tile_)
        t_out_pad = n_t * t_tile_
        # +halo_blk so the right-halo block of the last time tile is fully in-bounds.
        l_pad = t_out_pad + halo_blk

        # Cast to the (bf16) compute dtype and pad (left conv padding + right
        # alignment/halo padding) in a single fused pass.
        # TODO(synk): the boundary zero-fill could be done in-kernel under pl.when
        # to save this extra HBM pass over x.
        x_pad = jnp.pad(x.astype(compute_dtype),
                        ((0, 0), (0, 0), (padding, l_pad - padding - T)))

        kernel = functools.partial(_conv1d_kernel, dilation=dilation, kernel_size=K)
        halo_stride = t_tile_ // halo_blk          # t_tile_ is a multiple of halo_blk

        out = pl.pallas_call(
            kernel,
            out_shape=jax.ShapeDtypeStruct((B, C_out, t_out_pad), x.dtype),
            grid=(B, n_t),
            in_specs=[
                # main input tile
                pl.BlockSpec((1, C_in, t_tile_), lambda b, t: (b, 0, t)),
                # right-halo tile of the same input (128 lanes, small extra DMA)
                pl.BlockSpec((1, C_in, halo_blk),
                             lambda b, t: (b, 0, (t + 1) * halo_stride)),
                # weight / bias: constant block index -> fetched once, VMEM-resident
                pl.BlockSpec((C_out, K * C_in), lambda b, t: (0, 0)),
                pl.BlockSpec((C_out, 1), lambda b, t: (0, 0)),
            ],
            out_specs=pl.BlockSpec((1, C_out, t_tile_), lambda b, t: (b, 0, t)),
            compiler_params=pltpu.CompilerParams(
                dimension_semantics=("parallel", "parallel")),
            cost_estimate=pl.CostEstimate(
                flops=2 * B * C_out * C_in * K * t_out_pad,
                transcendentals=0,
                bytes_accessed=(x_pad.size * x_pad.dtype.itemsize
                                + w2.size * w2.dtype.itemsize
                                + B * C_out * t_out_pad
                                * jnp.dtype(x.dtype).itemsize)),
        )(x_pad, x_pad, w2, b2)

    out = out[:, :, :t_out]
    if stride > 1:
        # TODO(synk): stride > 1 is realized by computing the stride-1 conv and
        # subsampling (correct, not work-optimal; strided pl.ds loads would fix it).
        out = out[:, :, ::stride]
    return out


def _init_conv_norm_params(key, in_channels, out_channels, kernel_size,
                           w_init_gain="linear"):
    """xavier_uniform_ weight (calculate_gain('linear') == 1.0) + PyTorch default bias."""
    kw, kb = jax.random.split(key)
    fan_in = in_channels * kernel_size
    fan_out = out_channels * kernel_size
    gain = 1.0  # calculate_gain('linear')
    w_bound = gain * (6.0 / (fan_in + fan_out)) ** 0.5
    weight = jax.random.uniform(
        kw, (out_channels, in_channels, kernel_size),
        minval=-w_bound, maxval=w_bound, dtype=jnp.float32)
    b_bound = 1.0 / (fan_in ** 0.5)
    bias = jax.random.uniform(
        kb, (out_channels,), minval=-b_bound, maxval=b_bound, dtype=jnp.float32)
    return weight, bias


def _reference(x, weight, bias, *, stride, padding, dilation, compute_dtype):
    """lax.conv reference using the same bf16 casts + f32 accumulation."""
    out = lax.conv_general_dilated(
        x.astype(compute_dtype), weight.astype(compute_dtype),
        window_strides=(stride,), padding=((padding, padding),),
        rhs_dilation=(dilation,), dimension_numbers=("NCH", "OIH", "NCH"),
        preferred_element_type=jnp.float32)
    return (out + bias[None, :, None]).astype(x.dtype)


def _check(key, B, C_in, C_out, T, K, dilation):
    kx, kp = jax.random.split(key)
    x = jax.random.normal(kx, (B, C_in, T), dtype=jnp.float32)
    weight, bias = _init_conv_norm_params(kp, C_in, C_out, K)
    padding = int(dilation * (K - 1) / 2)

    out = conv_norm_forward(x, weight, bias, stride=1, padding=None,
                            dilation=dilation)
    out = jax.block_until_ready(out)
    assert out.shape == (B, C_out, T), out.shape

    ref = _reference(x, weight, bias, stride=1, padding=padding,
                     dilation=dilation, compute_dtype=jnp.bfloat16)
    err = float(jnp.max(jnp.abs(out - ref)))
    assert jnp.allclose(out, ref, atol=2e-3, rtol=2e-3), err
    return out


if __name__ == "__main__":
    key = jax.random.PRNGKey(0)
    k1, k2, k3 = jax.random.split(key, 3)

    # ConvNorm(4, 8) default kernel_size=1 (pointwise fast path): B=2, T=16.
    _check(k1, B=2, C_in=4, C_out=8, T=16, K=1, dilation=1)
    # ConvNorm(4, 8, kernel_size=3): B=2, T=16.
    _check(k2, B=2, C_in=4, C_out=8, T=16, K=3, dilation=1)
    # Exercise the halo / dilation path: ConvNorm(8, 16, kernel_size=5, dilation=2).
    _check(k3, B=2, C_in=8, C_out=16, T=40, K=5, dilation=2)

    print("KERNEL_OK")
</pallas_src>

<mosaic_0001>
module attributes {stable_mosaic.version = 11 : i64} {
  func.func @_conv1d_k1_kernel(%arg0: i32, %arg1: i32, %arg2: memref<1x4x128xbf16, #tpu.memory_space<vmem>>, %arg3: memref<8x4xbf16, #tpu.memory_space<vmem>>, %arg4: memref<8x1xf32, #tpu.memory_space<vmem>>, %arg5: memref<1x8x128xf32, #tpu.memory_space<vmem>>) attributes {dimension_semantics = [#tpu.dimension_semantics<parallel>, #tpu.dimension_semantics<parallel>], iteration_bounds = array<i64: 2, 1>, scalar_prefetch = 0 : i64, scratch_operands = 0 : i64, tpu.core_type = #tpu.core_type<tc>, window_params = [{transform_indices = @transform_0, window_bounds = array<i64: 1, 4, 128>}, {pipeline_mode = #tpu.pipeline_mode<synchronous>, transform_indices = @transform_1, window_bounds = array<i64: 8, 4>}, {pipeline_mode = #tpu.pipeline_mode<synchronous>, transform_indices = @transform_2, window_bounds = array<i64: 8, 1>}, {transform_indices = @transform_3, window_bounds = array<i64: 1, 8, 128>}]} {
    %c0 = arith.constant 0 : index
    %c0_0 = arith.constant 0 : index
    %0 = vector.load %arg3[%c0, %c0_0] : memref<8x4xbf16, #tpu.memory_space<vmem>>, vector<8x4xbf16>
    %c0_1 = arith.constant 0 : index
    %c0_2 = arith.constant 0 : index
    %c0_3 = arith.constant 0 : index
    %1 = vector.load %arg2[%c0_1, %c0_2, %c0_3] : memref<1x4x128xbf16, #tpu.memory_space<vmem>>, vector<1x4x128xbf16>
    %2 = vector.shape_cast %1 : vector<1x4x128xbf16> to vector<4x128xbf16>
    %cst = arith.constant dense<0.000000e+00> : vector<8x128xf32>
    %3 = tpu.matmul %0, %2, %cst {dimension_numbers = #tpu.dot_dimension_numbers<[1], [0], [0], [1], [0, 0, 1, 1], [], []>} : vector<8x4xbf16>, vector<4x128xbf16>, vector<8x128xf32> -> vector<8x128xf32>
    %c0_4 = arith.constant 0 : index
    %c0_5 = arith.constant 0 : index
    %4 = vector.load %arg4[%c0_4, %c0_5] : memref<8x1xf32, #tpu.memory_space<vmem>>, vector<8x1xf32>
    %5 = vector.broadcast %4 : vector<8x1xf32> to vector<8x128xf32>
    %6 = arith.addf %3, %5 : vector<8x128xf32>
    %c0_6 = arith.constant 0 : index
    %c0_7 = arith.constant 0 : index
    %c0_8 = arith.constant 0 : index
    %7 = vector.load %arg5[%c0_6, %c0_7, %c0_8] : memref<1x8x128xf32, #tpu.memory_space<vmem>>, vector<1x8x128xf32>
    %8 = vector.shape_cast %7 : vector<1x8x128xf32> to vector<8x128xf32>
    %9 = vector.shape_cast %6 : vector<8x128xf32> to vector<1x8x128xf32>
    tpu.vector_store %arg5[%c0_6, %c0_7, %c0_8], %9 {strides = array<i32>} : memref<1x8x128xf32, #tpu.memory_space<vmem>>, vector<1x8x128xf32>,
    return
  }
  func.func @transform_0(%arg0: i32, %arg1: i32) -> (i32, i32, i32) {
    %c0_i32 = arith.constant 0 : i32
    %c0_i32_0 = arith.constant 0 : i32
    return %arg0, %c0_i32, %arg1 : i32, i32, i32
  }
  func.func @transform_1(%arg0: i32, %arg1: i32) -> (i32, i32) {
    %c0_i32 = arith.constant 0 : i32
    %c0_i32_0 = arith.constant 0 : i32
    %c0_i32_1 = arith.constant 0 : i32
    return %c0_i32, %c0_i32_0 : i32, i32
  }
  func.func @transform_2(%arg0: i32, %arg1: i32) -> (i32, i32) {
    %c0_i32 = arith.constant 0 : i32
    %c0_i32_0 = arith.constant 0 : i32
    %c0_i32_1 = arith.constant 0 : i32
    return %c0_i32, %c0_i32_0 : i32, i32
  }
  func.func @transform_3(%arg0: i32, %arg1: i32) -> (i32, i32, i32) {
    %c0_i32 = arith.constant 0 : i32
    %c0_i32_0 = arith.constant 0 : i32
    return %arg0, %c0_i32, %arg1 : i32, i32, i32
  }
}

</mosaic_0001>

<bundles_post_ra>
// kernel: tpu_custom_call.1
= control target key start
LH: loop header
LB: loop body
LE: loop exit
PB: predicated region body
PF: predicated region fallthrough
CT: control target
= control target key end

     0   :  { %8 = vsyncpa [#allocation3], 0  ;;  %s633_s0 = inlined_call_operand.vmem [shape: bf16[2,4,128], index: 0, kind: input, shape index: {}]   ;;  %s634_s1 = inlined_call_operand.vmem [shape: bf16[8,4], index: 1, kind: input, shape index: {}]   ;;  %s635_s2 = inlined_call_operand.vmem [shape: f32[8,1], index: 2, kind: input, shape index: {}]   ;;  %s636_s3 = inlined_call_operand.hbm [shape: f32[2,8,128], index: 3, kind: output, shape index: {}]  }
   0x1   :  { %10 = vsyncpa [#allocation3 + $0x1], 0  ;;  %s516_s12 = smov 0   ;;  %s518_s13 = smov 0  }
   0x2   :  { %s520_s14 = smov 0   ;;  %s522_s15 = smov 0  }
   0x3   :  { %s524_s16 = smov 0   ;;  %s526_s17 = smov 0  }
   0x4 LB: > { %s335_s18 = sadd.s32 4294967295, %s490_s17   ;;  %s336_s19 = sadd.s32 4294967294, %s490_s17   ;;  %s490_s17 = sphi %s526_s17, %s16_s17   ;;  %s486_s16 = sphi %s524_s16, %s643_s16   ;;  %s482_s15 = sphi %s522_s15, %s642_s15   ;;  %s478_s14 = sphi %s520_s14, %s641_s14   ;;  %s474_s13 = sphi %s518_s13, %s640_s13   ;;  %s470_s12 = sphi %s516_s12, %s639_s12  }
   0x5   : > { %s28_s20 = sadd.s32 1, %s486_s16  ;;  %s107_s21 = sadd.s32 1, %s478_s14 }
   0x6   : > { %p30_p0 = scmp.ge.s32.totalorder %s28_s20, 2  ;;  %p117_p1 = scmp.ne.s32.totalorder %s478_s14, %s474_s13 }
   0x7   : > { %p118_p2 = scmp.eq.s32.totalorder %s335_s18, 1  ;;  %p123_p3 = scmp.ne.s32.totalorder %s474_s13, %s470_s12 }
   0x8   : > { %s645_s20 = smov (%p30_p0, %s28_s20), 0  ;;  %p124_p5 = scmp.eq.s32.totalorder %s336_s19, 1 }
   0x9   : > { %p556_p4 = por %p118_p2, %p117_p1  ;;  %s102_s23 = ssub.s32 %s486_s16, %s645_s20 }
   0xa   : > { %p339_p6 = scmp.ge.s32.totalorder %s490_s17, 1  ;;  %p105_p7 = scmp.eq.s32.totalorder %s102_s23, 0 }
   0xb   : > { %p563_p8 = por %p124_p5, %p123_p3  ;;  %p158_p9 = scmp.lt.s32.totalorder %s490_s17, 3 }
   0xc   : > { %s569_s25 = scalar_select %p105_p7, %s478_s14, %s107_s21  }
   0xd   : > { %p159_p10 = pnand %p339_p6, %p158_p9 }
   0xe   : > { %p184_p11 = scmp.lt.s32.totalorder (!%p159_p10), %s482_s15, 1  ;;  %s181_s8 = sand.u32 (!%p159_p10), 1, %s474_s13  }
   0xf   : > { %162 = sbr.rel (%p159_p10) target bundleno = 238 (0xee), region = 32  ;;  %s340_s9 = sshll.u32 (!%p159_p10), %s181_s8, 3 }
  0x10   : > { %s344_s10 = sshll.u32 (!%p159_p10), %s482_s15, 7  ;;  %s183_s11 = scalar_lea.vmem (!%p159_p10), [#allocation2], %s340_s9 }
  0x11   : > { %s264_s18 = sshll.u32 (!%p159_p10), %s183_s11, 4  ;;  %s587_s23 = scalar_lea.hbm (!%p159_p10), %s636_s3, %s344_s10  ;;  %s589_s18 = int_to_ptr.vmem [resolvable:$true] %s264_s18 }
  0x12   : > { %s250_s26 = scalar_lea.sflag (!%p159_p10), [#allocation3], %s181_s8  ;;  %s414_s27 = scalar_lea.vmem (!%p159_p10), %s589_s18, 128 }
  0x13   : > { %p415_p12 = scmp.ne.s32.totalorder (!%p159_p10), %s589_s18, %s414_s27 }
  0x14   : > { %v492_v0 = vmov 0.0   ;;  %vm493_vm0 = vmmov 0   ;;  %v194_v1 = vld [vmem:[%s635_s2] sm:$0xff]  ;;  %s185_s28 = scalar_select %p184_p11, %s482_s15, 1  ;;  %v494_v2 = vmov 0   ;;  %vm204_vm1 = vcmask 1041408  }
  0x15   : > { %349 = vmatprep.subr.bf16.mxu0 %v492_v0  ;;  %351 = vmatprep.mubr.msk.bf16.mxu0 %vm493_vm0, %v492_v0  ;;  %v192_v5 = vld [vmem:[%s634_s1] sm:$0xf]  ;;  %vm200_vm2 = vcmask 31744   ;;  %p416_p13 = pnand %p415_p12, %p556_p4  ;;  %s495_s15 = smov [#allocation2]  }
  0x16   : > { %413 = vset.pattern.permute.xlu0 %v494_v2  ;;  %s341_s29 = sshll.u32 %s185_s28, 1  ;;  %s418_s28 = sshll.u32 %s495_s15, 4  ;;  %s419_s28 = int_to_ptr.vmem [resolvable:$false] %s418_s28 }
  0x17   : > { %197 = vperm.xlu0 %413, %v194_v1   ;;  %s190_s5 = scalar_lea.vmem %s633_s0, %s341_s29  ;;  %p417_p0 = pneg %p416_p13 }
  0x18   : > { %v193_v3 = vld [vmem:[%s190_s5] sm:$0x3]  ;;  %s420_s29 = scalar_lea.vmem %s419_s28, 256  ;;  %p421_p1 = scmp.lt.s32.totalorder %s589_s18, %s419_s28 }
  0x19   : > { %v206_v4 = vsel %vm204_vm1, %v193_v3, 0  ;;  %p422_p2 = scmp.lt.s32.totalorder %s420_s29, %s414_s27 }
  0x1a   : > { %350 = vmatpush3.bf16.msra.mxu0 %v206_v4 }
  0x1b   : > { %p423_p3 = por %p422_p2, %p421_p1 }
  0x1d   : > { %352 = vmatmul.mubr.msk.bf16.vlgmr.msra.gmra.mxu0 %vm200_vm2, %v192_v5  ;;  %p424_p5 = pnand %p423_p3, %p417_p0 }
  0x92   : > { %v198_v6 = vpop.permute.xlu0 %197 }
  0xdd   : > { %v242_v7 = vpop.f32.mrf.mxu0 }
  0xde   : > { %v243_v8 = vadd.f32 %v242_v7, %v198_v6 }
  0xdf   : > { %v353_v9 = vpop.f32.mrf.mxu0 }
  0xe0   : > { %248 = vst [vmem:[%s183_s11] sm:$0xff] %v243_v8 }
  0xe1   : > { %v245_v10 = vpop.f32.mrf.mxu0 }
  0xe2   : > { %427 = shalt.err (!%p424_p5)
}
  0xe3   : > { %s428_s30 = scalar_lea.hbm %s587_s23, 128  ;;  %s432_s6 = scalar_lea.hbm %s636_s3, 256 }
  0xe4   : > { %p429_p6 = scmp.ne.s32.totalorder %s587_s23, %s428_s30  ;;  %p433_p10 = scmp.lt.s32.totalorder %s587_s23, %s636_s3 }
  0xe5   : > { %p434_p11 = scmp.lt.s32.totalorder %s432_s6, %s428_s30 }
  0xe6   : > { %p430_p7 = pnand %p429_p6, %p556_p4 }
  0xe7   : > { %p435_p12 = por %p434_p11, %p433_p10 }
  0xe8   : > { %p431_p9 = pneg %p430_p7 }
  0xea   : > { %p436_p13 = pnand %p435_p12, %p431_p9 }
  0xec   : > { %439 = shalt.err (!%p436_p13)
}
  0xed   : > { %355 = dma.vmem_to_hbm [thread:$0]  (%p556_p4), %s589_s18, 128, %s587_s23, %s250_s26   ;;  %v354_v11 = vpop.f32.mrf.mxu0 }
  0xee PF: > { %p361_p0 = scmp.ge.s32.totalorder %s490_s17, 2  ;;  %s276_s9 = sand.u32 1, %s470_s12  }
  0xef   : > { %s277_s10 = scalar_lea.sflag [#allocation3], %s276_s9 }
  0xf0   : > { %p358_p1 = pnand %p361_p0, %p563_p8 }
  0xf2   : > { %p359_p2 = pneg %p358_p1 }
  0xf4   : > { %465 = dma.done.wait (%p359_p2), %s277_s10, 128  }
  0xf5   : > { %467 = vsyncadd (%p359_p2), %s277_s10, 4294967168  ;;  %s16_s17 = sadd.s32 1, %s490_s17   ;;  %s639_s12 = smov %s474_s13 }
  0xf6   : > { %p13_p3 = scmp.ge.s32.totalorder %s16_s17, 4   ;;  %s640_s13 = smov %s478_s14 }
  0xf7   : > { %s641_s14 = smov %s569_s25  ;;  %s642_s15 = smov %s486_s16 }
  0xf8   : > { %s643_s16 = smov %s645_s20  ;;  %15 = sbr.rel (!%p13_p3) target bundleno = 4 (0x4), region = 67 }
  0xfd   :  { %282 = vsyncpa [#allocation3], 1 }
  0xfe   :  { %284 = vsyncpa [#allocation3 + $0x1], 1 }

</bundles_post_ra>
